<compile_context>
chip_gen: v7x
topology: tpu7x:2x2x1
jax: 0.10.0
libtpu: 0.0.40
codegen_flags: <defaults>
</compile_context>

<pallas_src>
import jax
import jax.numpy as jnp
from jax.experimental import pallas as pl
from jax.experimental.pallas import tpu as pltpu

D_IN = 256
D_HID = 256
D_OUT = 60
D_OUT_PAD = 128          # lane-dense padded output width
TM_MAX = 2048            # rows per tile; ~6.5 MiB VMEM at this size
BN_EPS = 1e-5


def _round_up(n, m):
    return ((n + m - 1) // m) * m


def _choose_tile(n):
    """Pick (tile_rows, padded_rows): tiles <= TM_MAX, balanced so batch
    padding waste is < 8 rows (instead of up to a full tile)."""
    n8 = _round_up(max(n, 1), 8)
    num_tiles = pl.cdiv(n8, TM_MAX)
    tm = _round_up(pl.cdiv(n8, num_tiles), 8)     # <= TM_MAX, multiple of 8
    return tm, tm * num_tiles


def project_kernel(x_ref, a_ref, c_ref, w1_ref, b1_ref, w2_ref, b2_ref, o_ref):
    # Folded BatchNorm (eval) + ReLU:  y = relu(x * a + c)          (VPU, f32)
    x = x_ref[...]                                            # (TM, 256) f32
    y = jnp.maximum(x * a_ref[...] + c_ref[...], 0.0)

    # Linear(256 -> 256) + ReLU; bf16 operands on the MXU, f32 accumulation.
    # (Dropout(0.4) == identity in eval mode.)
    h = jnp.dot(y.astype(jnp.bfloat16), w1_ref[...],
                preferred_element_type=jnp.float32) + b1_ref[...]
    h = jnp.maximum(h, 0.0)

    # Linear(256 -> 60), zero-padded to 128 lanes for unmasked stores.
    out = jnp.dot(h.astype(jnp.bfloat16), w2_ref[...],
                  preferred_element_type=jnp.float32) + b2_ref[...]
    o_ref[...] = out.astype(o_ref.dtype)


def fold_params(params):
    """Fold PyTorch-style params into kernel params.

    (gamma, beta, mean, var, w1, b1, w2, b2)  ->  (a, c, w1_bf16, b1, w2p_bf16, b2p)
    with the second Linear zero-padded from 60 to 128 output columns.
    """
    gamma, beta, mean, var, w1, b1, w2, b2 = params
    a = gamma * jax.lax.rsqrt(var + BN_EPS)                   # (1, 256)
    c = beta - mean * a                                       # (1, 256)
    w2p = jnp.zeros((D_HID, D_OUT_PAD), jnp.float32).at[:, :D_OUT].set(w2)
    b2p = jnp.zeros((1, D_OUT_PAD), jnp.float32).at[:, :D_OUT].set(b2)
    return (a, c, w1.astype(jnp.bfloat16), b1,
            w2p.astype(jnp.bfloat16), b2p)


@jax.jit
def project_forward(x, folded_params):
    """x: (N, 256) float32 -> (N, 60) float32."""
    a, c, w1, b1, w2p, b2p = folded_params
    n = x.shape[0]

    tm, n_pad = _choose_tile(n)
    if n_pad != n:
        x = jnp.pad(x, ((0, n_pad - n), (0, 0)))
    grid = (n_pad // tm,)

    # Batch-tiled input/output; weights/params resident across all grid steps.
    resident = lambda shape: pl.BlockSpec(shape, lambda i: (0, 0))
    in_specs = [
        pl.BlockSpec((tm, D_IN), lambda i: (i, 0)),           # x
        resident((1, D_IN)),                                  # a  (BN scale)
        resident((1, D_IN)),                                  # c  (BN shift)
        resident((D_IN, D_HID)),                              # w1 (bf16)
        resident((1, D_HID)),                                 # b1
        resident((D_HID, D_OUT_PAD)),                         # w2 padded (bf16)
        resident((1, D_OUT_PAD)),                             # b2 padded
    ]
    out_spec = pl.BlockSpec((tm, D_OUT_PAD), lambda i: (i, 0))

    flops = 2 * n_pad * (D_IN * D_HID + D_HID * D_OUT_PAD) + 4 * n_pad * D_IN
    bytes_accessed = (n_pad * D_IN * 4 + n_pad * D_OUT_PAD * 4
                      + D_IN * D_HID * 2 + D_HID * D_OUT_PAD * 2
                      + (2 * D_IN + D_HID + D_OUT_PAD) * 4)

    out_padded = pl.pallas_call(
        project_kernel,
        out_shape=jax.ShapeDtypeStruct((n_pad, D_OUT_PAD), jnp.float32),
        grid=grid,
        in_specs=in_specs,
        out_specs=out_spec,
        compiler_params=pltpu.CompilerParams(
            dimension_semantics=("parallel",)),
        cost_estimate=pl.CostEstimate(flops=flops, transcendentals=0,
                                      bytes_accessed=bytes_accessed),
    )(x, a, c, w1, b1, w2p, b2p)

    return out_padded[:n, :D_OUT]


def init_params(key):
    """Deterministic parameter init mirroring PyTorch module shapes."""
    k = jax.random.split(key, 8)

    # BatchNorm1d(256): affine params + running stats (stored as (1, 256) rows)
    gamma = jnp.ones((1, D_IN), jnp.float32)
    beta = jnp.zeros((1, D_IN), jnp.float32)
    running_mean = 0.1 * jax.random.normal(k[0], (1, D_IN), jnp.float32)
    running_var = jnp.abs(1.0 + 0.1 * jax.random.normal(k[1], (1, D_IN), jnp.float32))

    # Linear(256, 256): PyTorch default init U(-1/sqrt(fan_in), 1/sqrt(fan_in)),
    # stored transposed: (in_features, out_features).
    bound1 = 1.0 / jnp.sqrt(jnp.float32(D_IN))
    w1 = jax.random.uniform(k[2], (D_IN, D_HID), jnp.float32, -bound1, bound1)
    b1 = jax.random.uniform(k[3], (1, D_HID), jnp.float32, -bound1, bound1)

    # Linear(256, 60)
    bound2 = 1.0 / jnp.sqrt(jnp.float32(D_HID))
    w2 = jax.random.uniform(k[4], (D_HID, D_OUT), jnp.float32, -bound2, bound2)
    b2 = jax.random.uniform(k[5], (1, D_OUT), jnp.float32, -bound2, bound2)

    return (gamma, beta, running_mean, running_var, w1, b1, w2, b2)


def project_reference_f32(x, params):
    """Pure-JAX f32 reference for correctness checking."""
    gamma, beta, mean, var, w1, b1, w2, b2 = params
    y = (x - mean) * jax.lax.rsqrt(var + BN_EPS) * gamma + beta
    y = jnp.maximum(y, 0.0)
    h = jnp.maximum(y @ w1 + b1, 0.0)
    return h @ w2 + b2


def project_reference_bf16(x, params):
    """Pure-JAX reference matching the kernel's bf16-operand / f32-accum math."""
    gamma, beta, mean, var, w1, b1, w2, b2 = params
    a = gamma * jax.lax.rsqrt(var + BN_EPS)
    c = beta - mean * a
    y = jnp.maximum(x * a + c, 0.0)
    h = jnp.dot(y.astype(jnp.bfloat16), w1.astype(jnp.bfloat16),
                preferred_element_type=jnp.float32) + b1
    h = jnp.maximum(h, 0.0)
    return jnp.dot(h.astype(jnp.bfloat16), w2.astype(jnp.bfloat16),
                   preferred_element_type=jnp.float32) + b2


if __name__ == "__main__":
    key = jax.random.PRNGKey(0)
    kx, kp = jax.random.split(key)

    N = 8
    x = jax.random.normal(kx, (N, D_IN), jnp.float32)
    params = init_params(kp)
    folded = fold_params(params)

    out = project_forward(x, folded)
    out = jax.block_until_ready(out)
    assert out.shape == (N, D_OUT), out.shape

    # Tight check against a reference using the same bf16-operand matmul math.
    ref_bf16 = project_reference_bf16(x, params)
    assert jnp.allclose(out, ref_bf16, atol=2e-3, rtol=2e-3), \
        "mismatch vs bf16-matched reference"

    # Loose check against the exact f32 reference (bf16 matmul precision).
    ref_f32 = project_reference_f32(x, params)
    assert jnp.allclose(out, ref_f32, atol=5e-2, rtol=5e-2), \
        "mismatch vs f32 reference"

    # Non-divisible batch exercise (tile balancing / padding path).
    N2 = 37
    x2 = jax.random.normal(kx, (N2, D_IN), jnp.float32)
    out2 = jax.block_until_ready(project_forward(x2, folded))
    assert out2.shape == (N2, D_OUT), out2.shape
    assert jnp.allclose(out2, project_reference_bf16(x2, params),
                        atol=2e-3, rtol=2e-3), "mismatch on ragged batch"

    print("KERNEL_OK")
</pallas_src>

<mosaic_0001>
module attributes {stable_mosaic.version = 11 : i64} {
  func.func @project_kernel(%arg0: i32, %arg1: memref<8x256xf32, #tpu.memory_space<vmem>>, %arg2: memref<1x256xf32, #tpu.memory_space<vmem>>, %arg3: memref<1x256xf32, #tpu.memory_space<vmem>>, %arg4: memref<256x256xbf16, #tpu.memory_space<vmem>>, %arg5: memref<1x256xf32, #tpu.memory_space<vmem>>, %arg6: memref<256x128xbf16, #tpu.memory_space<vmem>>, %arg7: memref<1x128xf32, #tpu.memory_space<vmem>>, %arg8: memref<8x128xf32, #tpu.memory_space<vmem>>) attributes {dimension_semantics = [#tpu.dimension_semantics<parallel>], iteration_bounds = array<i64: 1>, scalar_prefetch = 0 : i64, scratch_operands = 0 : i64, tpu.core_type = #tpu.core_type<tc>, window_params = [{transform_indices = @transform_0, window_bounds = array<i64: 8, 256>}, {pipeline_mode = #tpu.pipeline_mode<synchronous>, transform_indices = @transform_1, window_bounds = array<i64: 1, 256>}, {pipeline_mode = #tpu.pipeline_mode<synchronous>, transform_indices = @transform_2, window_bounds = array<i64: 1, 256>}, {pipeline_mode = #tpu.pipeline_mode<synchronous>, transform_indices = @transform_3, window_bounds = array<i64: 256, 256>}, {pipeline_mode = #tpu.pipeline_mode<synchronous>, transform_indices = @transform_4, window_bounds = array<i64: 1, 256>}, {pipeline_mode = #tpu.pipeline_mode<synchronous>, transform_indices = @transform_5, window_bounds = array<i64: 256, 128>}, {pipeline_mode = #tpu.pipeline_mode<synchronous>, transform_indices = @transform_6, window_bounds = array<i64: 1, 128>}, {transform_indices = @transform_7, window_bounds = array<i64: 8, 128>}]} {
    %c0 = arith.constant 0 : index
    %c0_0 = arith.constant 0 : index
    %0 = vector.load %arg1[%c0, %c0_0] : memref<8x256xf32, #tpu.memory_space<vmem>>, vector<8x256xf32>
    %c0_1 = arith.constant 0 : index
    %c0_2 = arith.constant 0 : index
    %1 = vector.load %arg2[%c0_1, %c0_2] : memref<1x256xf32, #tpu.memory_space<vmem>>, vector<1x256xf32>
    %2 = vector.broadcast %1 : vector<1x256xf32> to vector<8x256xf32>
    %3 = arith.mulf %0, %2 : vector<8x256xf32>
    %c0_3 = arith.constant 0 : index
    %c0_4 = arith.constant 0 : index
    %4 = vector.load %arg3[%c0_3, %c0_4] : memref<1x256xf32, #tpu.memory_space<vmem>>, vector<1x256xf32>
    %5 = vector.broadcast %4 : vector<1x256xf32> to vector<8x256xf32>
    %6 = arith.addf %3, %5 : vector<8x256xf32>
    %cst = arith.constant 0.000000e+00 : f32
    %7 = vector.broadcast %cst : f32 to vector<8x256xf32>
    %8 = arith.maximumf %6, %7 : vector<8x256xf32>
    %9 = arith.truncf %8 : vector<8x256xf32> to vector<8x256xbf16>
    %c0_5 = arith.constant 0 : index
    %c0_6 = arith.constant 0 : index
    %10 = vector.load %arg4[%c0_5, %c0_6] : memref<256x256xbf16, #tpu.memory_space<vmem>>, vector<256x256xbf16>
    %cst_7 = arith.constant dense<0.000000e+00> : vector<8x256xf32>
    %11 = tpu.matmul %9, %10, %cst_7 {dimension_numbers = #tpu.dot_dimension_numbers<[1], [0], [0], [1], [0, 0, 1, 1], [], []>} : vector<8x256xbf16>, vector<256x256xbf16>, vector<8x256xf32> -> vector<8x256xf32>
    %c0_8 = arith.constant 0 : index
    %c0_9 = arith.constant 0 : index
    %12 = vector.load %arg5[%c0_8, %c0_9] : memref<1x256xf32, #tpu.memory_space<vmem>>, vector<1x256xf32>
    %13 = vector.broadcast %12 : vector<1x256xf32> to vector<8x256xf32>
    %14 = arith.addf %11, %13 : vector<8x256xf32>
    %cst_10 = arith.constant 0.000000e+00 : f32
    %15 = vector.broadcast %cst_10 : f32 to vector<8x256xf32>
    %16 = arith.maximumf %14, %15 : vector<8x256xf32>
    %17 = arith.truncf %16 : vector<8x256xf32> to vector<8x256xbf16>
    %c0_11 = arith.constant 0 : index
    %c0_12 = arith.constant 0 : index
    %18 = vector.load %arg6[%c0_11, %c0_12] : memref<256x128xbf16, #tpu.memory_space<vmem>>, vector<256x128xbf16>
    %cst_13 = arith.constant dense<0.000000e+00> : vector<8x128xf32>
    %19 = tpu.matmul %17, %18, %cst_13 {dimension_numbers = #tpu.dot_dimension_numbers<[1], [0], [0], [1], [0, 0, 1, 1], [], []>} : vector<8x256xbf16>, vector<256x128xbf16>, vector<8x128xf32> -> vector<8x128xf32>
    %c0_14 = arith.constant 0 : index
    %c0_15 = arith.constant 0 : index
    %20 = vector.load %arg7[%c0_14, %c0_15] : memref<1x128xf32, #tpu.memory_space<vmem>>, vector<1x128xf32>
    %21 = vector.broadcast %20 : vector<1x128xf32> to vector<8x128xf32>
    %22 = arith.addf %19, %21 : vector<8x128xf32>
    %c0_16 = arith.constant 0 : index
    %c0_17 = arith.constant 0 : index
    %23 = vector.load %arg8[%c0_16, %c0_17] : memref<8x128xf32, #tpu.memory_space<vmem>>, vector<8x128xf32>
    tpu.vector_store %arg8[%c0_16, %c0_17], %22 {strides = array<i32>} : memref<8x128xf32, #tpu.memory_space<vmem>>, vector<8x128xf32>,
    return
  }
  func.func @transform_0(%arg0: i32) -> (i32, i32) {
    %c0_i32 = arith.constant 0 : i32
    %c0_i32_0 = arith.constant 0 : i32
    return %arg0, %c0_i32 : i32, i32
  }
  func.func @transform_1(%arg0: i32) -> (i32, i32) {
    %c0_i32 = arith.constant 0 : i32
    %c0_i32_0 = arith.constant 0 : i32
    %c0_i32_1 = arith.constant 0 : i32
    return %c0_i32, %c0_i32_0 : i32, i32
  }
  func.func @transform_2(%arg0: i32) -> (i32, i32) {
    %c0_i32 = arith.constant 0 : i32
    %c0_i32_0 = arith.constant 0 : i32
    %c0_i32_1 = arith.constant 0 : i32
    return %c0_i32, %c0_i32_0 : i32, i32
  }
  func.func @transform_3(%arg0: i32) -> (i32, i32) {
    %c0_i32 = arith.constant 0 : i32
    %c0_i32_0 = arith.constant 0 : i32
    %c0_i32_1 = arith.constant 0 : i32
    return %c0_i32, %c0_i32_0 : i32, i32
  }
  func.func @transform_4(%arg0: i32) -> (i32, i32) {
    %c0_i32 = arith.constant 0 : i32
    %c0_i32_0 = arith.constant 0 : i32
    %c0_i32_1 = arith.constant 0 : i32
    return %c0_i32, %c0_i32_0 : i32, i32
  }
  func.func @transform_5(%arg0: i32) -> (i32, i32) {
    %c0_i32 = arith.constant 0 : i32
    %c0_i32_0 = arith.constant 0 : i32
    %c0_i32_1 = arith.constant 0 : i32
    return %c0_i32, %c0_i32_0 : i32, i32
  }
  func.func @transform_6(%arg0: i32) -> (i32, i32) {
    %c0_i32 = arith.constant 0 : i32
    %c0_i32_0 = arith.constant 0 : i32
    %c0_i32_1 = arith.constant 0 : i32
    return %c0_i32, %c0_i32_0 : i32, i32
  }
  func.func @transform_7(%arg0: i32) -> (i32, i32) {
    %c0_i32 = arith.constant 0 : i32
    %c0_i32_0 = arith.constant 0 : i32
    return %arg0, %c0_i32 : i32, i32
  }
}

</mosaic_0001>

<bundles_post_ra>
// kernel: project_forward.1
= control target key start
LH: loop header
LB: loop body
LE: loop exit
PB: predicated region body
PF: predicated region fallthrough
CT: control target
= control target key end

     0   :  { %12 = vsyncpa [#allocation3], 0  ;;  %s900_s0 = inlined_call_operand.hbm [shape: f32[8,256], index: 0, kind: input, shape index: {}]   ;;  %s901_s1 = inlined_call_operand.vmem [shape: f32[1,256], index: 1, kind: input, shape index: {}]   ;;  %s902_s2 = inlined_call_operand.vmem [shape: f32[1,256], index: 2, kind: input, shape index: {}]   ;;  %s903_s3 = inlined_call_operand.hbm [shape: bf16[256,256], index: 3, kind: input, shape index: {}]   ;;  %s904_s4 = inlined_call_operand.vmem [shape: f32[1,256], index: 4, kind: input, shape index: {}]   ;;  %s905_s5 = inlined_call_operand.hbm [shape: bf16[256,128], index: 5, kind: input, shape index: {}]   ;;  %s906_s6 = inlined_call_operand.vmem [shape: f32[1,128], index: 6, kind: input, shape index: {}]   ;;  %s907_s7 = inlined_call_operand.hbm [shape: f32[8,128], index: 7, kind: output, shape index: {}]  }
   0x1   :  { %13 = vsyncpa [#allocation6], 0 }
   0x2   :  { %14 = vsyncpa [#allocation4], 0  ;;  %s779_s24 = smov [#allocation5]   ;;  %s685_s28 = scalar_lea.hbm %s903_s3, 4096 }
   0x3   :  { %s34_s25 = sshll.u32 %s779_s24, 4  ;;  %p686_p0 = scmp.ne.s32.totalorder %s903_s3, %s685_s28  ;;  %s35_s25 = int_to_ptr.vmem [resolvable:$true] %s34_s25 }
   0x4   :  { %p689_p1 = scmp.lt.u32.totalorder %s685_s28, %s903_s3 }
   0x6   :  { %p691_p2 = pnand %p689_p1, %p686_p0 }
   0x8   :  { %694 = shalt.err (!%p691_p2)
}
   0x9   :  { %s695_s10 = scalar_lea.vmem %s35_s25, 4096  ;;  %p700_p4 = scmp.lt.s32.totalorder %s35_s25, %s35_s25 }
   0xa   :  { %p696_p3 = scmp.ne.s32.totalorder %s35_s25, %s695_s10  ;;  %p701_p5 = scmp.lt.s32.totalorder %s695_s10, %s695_s10 }
   0xc   :  { %p702_p6 = por %p701_p5, %p700_p4 }
   0xe   :  { %p703_p7 = pnand %p702_p6, %p696_p3 }
  0x10   :  { %706 = shalt.err (!%p703_p7)
}
  0x11   :  { %s780_s11 = smov 128   ;;  %s781_s12 = smov 8  }
  0x12   :  { %40 = dma.hbm_to_vmem [thread:$0]  %s903_s3, 4096, %s35_s25, [#allocation6], %s780_s11, %s780_s11, %s781_s12  }
  0x13   :  { %s782_s15 = smov [#allocation2]   ;;  %s783_s17 = smov [#allocation7]  }
  0x14   :  { %s21_s16 = sshll.u32 %s782_s15, 4  ;;  %s48_s18 = sshll.u32 %s783_s17, 4  ;;  %s22_s16 = int_to_ptr.vmem [resolvable:$true] %s21_s16  ;;  %s49_s18 = int_to_ptr.vmem [resolvable:$true] %s48_s18 }
  0x15   :  { %s707_s21 = scalar_lea.hbm %s900_s0, 256 }
  0x16   :  { %p708_p8 = scmp.ne.s32.totalorder %s900_s0, %s707_s21  ;;  %p711_p9 = scmp.lt.u32.totalorder %s707_s21, %s900_s0 }
  0x18   :  { %p713_p10 = pnand %p711_p9, %p708_p8 }
  0x1a   :  { %716 = shalt.err (!%p713_p10)
}
  0x1b   :  { %s717_s3 = scalar_lea.vmem %s22_s16, 256  ;;  %p722_p12 = scmp.lt.s32.totalorder %s22_s16, %s22_s16 }
  0x1c   :  { %p718_p11 = scmp.ne.s32.totalorder %s22_s16, %s717_s3  ;;  %p723_p13 = scmp.lt.s32.totalorder %s717_s3, %s717_s3 }
  0x1e   :  { %p724_p0 = por %p723_p13, %p722_p12 }
  0x20   :  { %p725_p1 = pnand %p724_p0, %p718_p11 }
  0x22   :  { %728 = shalt.err (!%p725_p1)
}
  0x23   :  { %24 = dma.hbm_to_vmem [thread:$0]  %s900_s0, 256, %s22_s16, [#allocation3]  }
  0x24   :  { %s729_s30 = scalar_lea.hbm %s905_s5, 2048 }
  0x25   :  { %p730_p2 = scmp.ne.s32.totalorder %s905_s5, %s729_s30  ;;  %p733_p3 = scmp.lt.u32.totalorder %s729_s30, %s905_s5 }
  0x27   :  { %p735_p4 = pnand %p733_p3, %p730_p2 }
  0x29   :  { %738 = shalt.err (!%p735_p4)
}
  0x2a   :  { %s739_s12 = scalar_lea.vmem %s49_s18, 2048  ;;  %p744_p6 = scmp.lt.s32.totalorder %s49_s18, %s49_s18 }
  0x2b   :  { %p740_p5 = scmp.ne.s32.totalorder %s49_s18, %s739_s12  ;;  %p745_p7 = scmp.lt.s32.totalorder %s739_s12, %s739_s12 }
  0x2d   :  { %p746_p8 = por %p745_p7, %p744_p6 }
  0x2f   :  { %p747_p9 = pnand %p746_p8, %p740_p5 }
  0x31   :  { %750 = shalt.err (!%p747_p9)
}
  0x32   :  { %s784_s0 = smov 64   ;;  %s785_s13 = smov 4  }
  0x33   :  { %54 = dma.hbm_to_vmem [thread:$0]  %s905_s5, 2048, %s49_s18, [#allocation6], %s784_s0, %s784_s0, %s785_s13  }
  0x34   :  { %773 = dma.done.wait [#allocation3], 256  }
  0x35   :  { %774 = vsyncadd [#allocation3], 4294967040 }
  0x36   :  { %775 = dma.done.wait [#allocation6], 6144  }
  0x37   :  { %776 = vsyncadd [#allocation6], 4294961152  ;;  %v621_v0 = vld [vmem:[#allocation5 + $0x4] ss:$8 sps:$4 sm:$0xff]   ;;  %v623_v1 = vld [vmem:[#allocation5] ss:$8 sps:$4 sm:$0xff]   ;;  %v71_v7 = vlaneseq }
  0x38   :  { %305 = vmatprep.subr.bf16.mxu0 %v621_v0  ;;  %v624_v2 = vld [vmem:[#allocation5 + $0x14] ss:$8 sps:$4 sm:$0xff]   ;;  %v626_v3 = vld [vmem:[#allocation5 + $0x10] ss:$8 sps:$4 sm:$0xff]   ;;  %v627_v4 = vld [vmem:[#allocation5 + $0x24] ss:$8 sps:$4 sm:$0xff]  }
  0x39   :  { %306 = vmatpush1.bf16.msra.mxu0 %v623_v1  ;;  %v629_v5 = vld [vmem:[#allocation5 + $0x20] ss:$8 sps:$4 sm:$0xff]   ;;  %v630_v6 = vld [vmem:[#allocation5 + $0x34] ss:$8 sps:$4 sm:$0xff]   ;;  %v632_v8 = vld [vmem:[#allocation5 + $0x30] ss:$8 sps:$4 sm:$0xff]  }
  0x3a   :  { %307 = vmatprep.subr.bf16.mxu0 %v624_v2  ;;  %v633_v9 = vld [vmem:[#allocation5 + $0x44] ss:$8 sps:$4 sm:$0xff]   ;;  %v72_v10 = vshrl.u32 %v71_v7, 7  ;;  %v635_v11 = vld [vmem:[#allocation5 + $0x40] ss:$8 sps:$4 sm:$0xff]   ;;  %v68_v17 = vld [vmem:[#allocation2 + $0x8] sm:$0xff] }
  0x3b   :  { %v636_v12 = vld [vmem:[#allocation5 + $0x54] ss:$8 sps:$4 sm:$0xff]   ;;  %v638_v14 = vld [vmem:[#allocation5 + $0x50] ss:$8 sps:$4 sm:$0xff]   ;;  %v639_v15 = vld [vmem:[#allocation5 + $0x64] ss:$8 sps:$4 sm:$0xff]  }
  0x3c   :  { %v863_v13 = vsub.s32 1, %v72_v10  ;;  %v641_v16 = vld [vmem:[#allocation5 + $0x60] ss:$8 sps:$4 sm:$0xff]   ;;  %v868_v18 = vld [vmem:[%s901_s1] sm:$0x3]  ;;  %v675_v36 = vld [vmem:[#allocation7 + $0x58] sm:$0xff]  }
  0x3d   :  { %308 = vmatpush1.bf16.msra.mxu0 %v626_v3  ;;  %v642_v19 = vld [vmem:[#allocation5 + $0x74] ss:$8 sps:$4 sm:$0xff]   ;;  %v875_v21 = vld [vmem:[%s902_s2] sm:$0x3]  ;;  %v669_v23 = vld [vmem:[#allocation7 + $0x40] sm:$0xff]   ;;  %v73_v46 = vsub.s32 0, %v72_v10 }
  0x3e   :  { %309 = vmatprep.subr.bf16.mxu0 %v627_v4  ;;  %v78_v20 = vrot.slane %v868_v18, %v863_v13  ;;  %v92_v22 = vrot.slane %v875_v21, %v863_v13  ;;  %v670_v25 = vld [vmem:[#allocation7] sm:$0xff]   ;;  %v644_v26 = vld [vmem:[#allocation5 + $0x70] ss:$8 sps:$4 sm:$0xff]   ;;  %591 = vmatprep.subr.bf16.mxu1 %v669_v23  ;;  %v671_v27 = vld [vmem:[#allocation7 + $0x48] sm:$0xff]  }
  0x3f   :  { %592 = vmatpush3.bf16.msra.mxu1 %v670_v25  ;;  %v672_v29 = vld [vmem:[#allocation7 + $0x8] sm:$0xff]   ;;  %v673_v30 = vld [vmem:[#allocation7 + $0x50] sm:$0xff]   ;;  %v676_v40 = vld [vmem:[#allocation7 + $0x18] sm:$0xff]   ;;  %v74_v50 = vrot.slane %v868_v18, %v73_v46  ;;  %v88_v54 = vrot.slane %v875_v21, %v73_v46 }
  0x40   :  { %v82_v24 = vmul.f32 %v78_v20, %v68_v17  ;;  %593 = vmatprep.subr.bf16.mxu1 %v671_v27  ;;  %v645_v31 = vld [vmem:[#allocation5 + $0x84] ss:$8 sps:$4 sm:$0xff]   ;;  %v647_v33 = vld [vmem:[#allocation5 + $0x80] ss:$8 sps:$4 sm:$0xff]   ;;  %v674_v35 = vld [vmem:[#allocation7 + $0x10] sm:$0xff]  }
  0x41   :  { %310 = vmatpush1.bf16.msra.mxu0 %v629_v5  ;;  %v648_v37 = vld [vmem:[#allocation5 + $0x94] ss:$8 sps:$4 sm:$0xff]   ;;  %v650_v38 = vld [vmem:[#allocation5 + $0x90] ss:$8 sps:$4 sm:$0xff]   ;;  %v651_v39 = vld [vmem:[#allocation5 + $0xa4] ss:$8 sps:$4 sm:$0xff]  }
  0x42   :  { %311 = vmatprep.subr.bf16.mxu0 %v630_v6  ;;  %v96_v28 = vadd.f32 %v92_v22, %v82_v24  ;;  %v677_v41 = vld [vmem:[#allocation7 + $0x60] sm:$0xff]   ;;  %v679_v44 = vld [vmem:[#allocation7 + $0x68] sm:$0xff]   ;;  %v654_v45 = vld [vmem:[#allocation5 + $0xb4] ss:$8 sps:$4 sm:$0xff]  }
  0x43   :  { %594 = vmatpush3.bf16.msra.mxu1 %v672_v29  ;;  %v678_v42 = vld [vmem:[#allocation7 + $0x20] sm:$0xff]   ;;  %v680_v47 = vld [vmem:[#allocation7 + $0x28] sm:$0xff]   ;;  %v656_v48 = vld [vmem:[#allocation5 + $0xb0] ss:$8 sps:$4 sm:$0xff]  }
  0x44   :  { %v98_v32 = vmax.f32 %v96_v28, 0.0  ;;  %595 = vmatprep.subr.bf16.mxu1 %v673_v30  ;;  %v653_v43 = vld [vmem:[#allocation5 + $0xa0] ss:$8 sps:$4 sm:$0xff]   ;;  %v657_v49 = vld [vmem:[#allocation5 + $0xc4] ss:$8 sps:$4 sm:$0xff]   ;;  %v67_v52 = vld [vmem:[#allocation2] sm:$0xff] }
  0x45   :  { %312 = vmatpush1.bf16.msra.mxu0 %v632_v8  ;;  %v659_v51 = vld [vmem:[#allocation5 + $0xc0] ss:$8 sps:$4 sm:$0xff]   ;;  %v660_v53 = vld [vmem:[#allocation5 + $0xd4] ss:$8 sps:$4 sm:$0xff]   ;;  %v81_v55 = vmul.f32 %v74_v50, %v67_v52  ;;  %v662_v56 = vld [vmem:[#allocation5 + $0xd0] ss:$8 sps:$4 sm:$0xff]  }
  0x46   :  { %313 = vmatprep.subr.bf16.mxu0 %v633_v9  ;;  %v100_v34 = vpack.c.bf16 %v98_v32, %v98_v32  ;;  %v663_v57 = vld [vmem:[#allocation5 + $0xe4] ss:$8 sps:$4 sm:$0xff]   ;;  %v665_v59 = vld [vmem:[#allocation5 + $0xe0] ss:$8 sps:$4 sm:$0xff]   ;;  %v666_v60 = vld [vmem:[#allocation5 + $0xf4] ss:$8 sps:$4 sm:$0xff]  }
  0x47   :  { %596 = vmatpush3.bf16.msra.mxu1 %v674_v35  ;;  %v95_v58 = vadd.f32 %v88_v54, %v81_v55  ;;  %v668_v62 = vld [vmem:[#allocation5 + $0xf0] ss:$8 sps:$4 sm:$0xff]  }
  0x48   :  { %337 = vmatprep.mubr.bf16.mxu0 %v100_v34  ;;  %597 = vmatprep.subr.bf16.mxu1 %v675_v36  ;;  %v681_v0 = vld [vmem:[#allocation7 + $0x70] sm:$0xff]   ;;  %v683_v2 = vld [vmem:[#allocation7 + $0x78] sm:$0xff]  }
  0x49   :  { %314 = vmatpush1.bf16.msra.mxu0 %v635_v11  ;;  %v97_v61 = vmax.f32 %v95_v58, 0.0  ;;  %v682_v1 = vld [vmem:[#allocation7 + $0x30] sm:$0xff]   ;;  %v684_v3 = vld [vmem:[#allocation7 + $0x38] sm:$0xff]  }
  0x4a   :  { %315 = vmatprep.subr.bf16.mxu0 %v636_v12  ;;  %v133_v4 = vld [vmem:[%s904_s4] sm:$0x3]  ;;  %s786_s4 = smov [#allocation8]  }
  0x4b   :  { %598 = vmatpush3.bf16.msra.mxu1 %v676_v40  ;;  %v99_v63 = vpack.c.bf16 %v97_v61, %v97_v61  ;;  %v138_v5 = vrot.slane %v133_v4, %v73_v46  ;;  %v142_v6 = vrot.slane %v133_v4, %v863_v13  ;;  %s532_s21 = sshll.u32 %s786_s4, 4  ;;  %s533_s21 = int_to_ptr.vmem [resolvable:$true] %s532_s21 }
  0x4c   :  { %599 = vmatprep.subr.bf16.mxu1 %v677_v41  ;;  %s751_s22 = scalar_lea.vmem %s533_s21, 128  ;;  %p756_p11 = scmp.lt.s32.totalorder %s533_s21, %s533_s21 }
  0x4d   :  { %316 = vmatpush1.bf16.msra.mxu0 %v638_v14  ;;  %p752_p10 = scmp.ne.s32.totalorder %s533_s21, %s751_s22  ;;  %p757_p12 = scmp.lt.s32.totalorder %s751_s22, %s751_s22 }
  0x4e   :  { %317 = vmatprep.subr.bf16.mxu0 %v639_v15 }
  0x4f   :  { %600 = vmatpush3.bf16.msra.mxu1 %v678_v42  ;;  %p758_p13 = por %p757_p12, %p756_p11 }
  0x50   :  { %601 = vmatprep.subr.bf16.mxu1 %v679_v44 }
  0x51   :  { %318 = vmatpush1.bf16.msra.mxu0 %v641_v16  ;;  %p759_p0 = pnand %p758_p13, %p752_p10 }
  0x52   :  { %319 = vmatprep.subr.bf16.mxu0 %v642_v19  ;;  %v574_v19 = vld [vmem:[%s906_s6] ss:$0 sm:$0xff] }
  0x53   :  { %602 = vmatpush3.bf16.msra.mxu1 %v680_v47 }
  0x54   :  { %603 = vmatprep.subr.bf16.mxu1 %v681_v0 }
  0x55   :  { %320 = vmatpush1.bf16.msra.mxu0 %v644_v26 }
  0x56   :  { %321 = vmatprep.subr.bf16.mxu0 %v645_v31 }
  0x57   :  { %604 = vmatpush3.bf16.msra.mxu1 %v682_v1 }
  0x58   :  { %605 = vmatprep.subr.bf16.mxu1 %v683_v2 }
  0x59   :  { %322 = vmatpush1.bf16.msra.mxu0 %v647_v33 }
  0x5a   :  { %323 = vmatprep.subr.bf16.mxu0 %v648_v37 }
  0x5b   :  { %606 = vmatpush3.bf16.msra.mxu1 %v684_v3 }
  0x5d   :  { %324 = vmatpush1.bf16.msra.mxu0 %v650_v38 }
  0x5e   :  { %325 = vmatprep.subr.bf16.mxu0 %v651_v39 }
  0x61   :  { %326 = vmatpush1.bf16.msra.mxu0 %v653_v43 }
  0x62   :  { %327 = vmatprep.subr.bf16.mxu0 %v654_v45 }
  0x65   :  { %328 = vmatpush1.bf16.msra.mxu0 %v656_v48 }
  0x66   :  { %329 = vmatprep.subr.bf16.mxu0 %v657_v49 }
  0x69   :  { %330 = vmatpush1.bf16.msra.mxu0 %v659_v51 }
  0x6a   :  { %331 = vmatprep.subr.bf16.mxu0 %v660_v53 }
  0x6d   :  { %332 = vmatpush1.bf16.msra.mxu0 %v662_v56 }
  0x6e   :  { %333 = vmatprep.subr.bf16.mxu0 %v663_v57 }
  0x71   :  { %334 = vmatpush1.bf16.msra.mxu0 %v665_v59 }
  0x72   :  { %335 = vmatprep.subr.bf16.mxu0 %v666_v60 }
  0x75   :  { %336 = vmatpush1.bf16.msra.mxu0 %v668_v62 }
  0x78   :  { %338 = vmatmul.mubr.bf16.vlgmr.msra.gmra.mrb[0].mxu0 %v99_v63 }
 0x14b   :  { %v339_v7 = vpop.f32.mrb[0].mxu0 }
 0x14c   :  { %v340_v8 = vadd.f32 %v339_v7, %v138_v5  ;;  %v341_v9 = vpop.f32.mrb[1].mxu0 }
 0x14d   :  { %v342_v10 = vadd.f32 %v341_v9, %v142_v6  ;;  %v343_v11 = vpop.f32.mrb[2].mxu0 }
 0x14e   :  { %v346_v12 = vmax.f32 %v340_v8, 0.0  ;;  %v344_v14 = vpop.f32.mrb[3].mxu0 }
 0x14f   :  { %v347_v15 = vmax.f32 %v342_v10, 0.0 }
 0x150   :  { %v348_v17 = vpack.c.bf16 %v346_v12, %v346_v12 }
 0x151   :  { %v349_v16 = vpack.c.bf16 %v347_v15, %v347_v15 }
 0x153   :  { %517 = vmatprep.mubr.bf16.mxu1 %v349_v16 }
 0x154   :  { %518 = vmatmul.mubr.bf16.vlgmr.msra.gmra.mrb[0].mxu1 %v348_v17 }
 0x227   :  { %v607_v18 = vpop.f32.mrb[0].mxu1 }
 0x228   :  { %v608_v20 = vpop.f32.mrb[1].mxu1 }
 0x229   :  { %v609_v13 = vadd.f32 %v608_v20, %v607_v18  ;;  %v610_v21 = vpop.f32.mrb[2].mxu1 }
 0x22a   :  { %v611_v22 = vpop.f32.mrb[3].mxu1 }
 0x22b   :  { %v520_v23 = vadd.f32 %v609_v13, %v574_v19 }
 0x22d   :  { %525 = vst [vmem:[#allocation8] sm:$0xff] %v520_v23 }
 0x22e   :  { %762 = shalt.err (!%p759_p0)
}
 0x22f   :  { %s763_s6 = scalar_lea.hbm %s907_s7, 128 }
 0x230   :  { %p764_p1 = scmp.ne.s32.totalorder %s907_s7, %s763_s6  ;;  %p767_p2 = scmp.lt.u32.totalorder %s763_s6, %s907_s7 }
 0x232   :  { %p769_p3 = pnand %p767_p2, %p764_p1 }
 0x234   :  { %772 = shalt.err (!%p769_p3)
}
 0x235   :  { %535 = dma.vmem_to_hbm [thread:$0]  %s533_s21, 128, %s907_s7, [#allocation4]  }
 0x236   :  { %777 = dma.done.wait [#allocation4], 128  }
 0x237   :  { %778 = vsyncadd [#allocation4], 4294967168 }
 0x238   :  { %539 = vsyncpa [#allocation3], 1 }
 0x239   :  { %540 = vsyncpa [#allocation6], 1 }
 0x23a   :  { %541 = vsyncpa [#allocation4], 1 }

</bundles_post_ra>
